<compile_context>
chip_gen: v6e
topology: v6e:2x2x1
jax: 0.10.0
libtpu: 0.0.40
codegen_flags: <defaults>
</compile_context>

<pallas_src>
import functools

import jax
import jax.numpy as jnp
from jax.experimental import pallas as pl
from jax.experimental.pallas import tpu as pltpu

# ---- "config" constants (synthetic, consistent with the module) -------------
WORDS_SIZE = 16           # T  : words per review
WORD_EMBEDDING_DIM = 32   # E  : word embedding dim (conv in_channels)
NUM_OF_FILTERS = 32       # F  : conv out_channels
WINDOW_SIZE_CNN = 3       # K  : conv kernel size (odd -> "same" length)
ID_EMBEDDING_DIM = 32     # ID : id embedding dim
ATTEN_VEC_DIM = 32        # A  : attention vector dim

VOCAB_SIZE = 50
NUM_IDS = 10
BATCH = 2


# ---- Pallas kernel (whole batch tile per grid step) ---------------------------
def _review_encoder_kernel(x_ref, wc_ref, bc_ref, id_ref, wl1_ref, bl1_ref,
                           a1_ref, o_ref, *, BT, T):
    # x_ref  : (BT*T, K*E)  im2col'd padded word embeddings for BT reviews
    # wc_ref : (K*E, F)     conv weight in im2col layout
    # bc_ref : (1, F)       conv bias
    # id_ref : (BT, ID)     id embeddings
    # wl1_ref: (ID, A)      l1 weight (already transposed)
    # bl1_ref: (1, A)       l1 bias
    # a1_ref : (A, F)       A1
    # o_ref  : (BT, F)      pooled review representations
    Fn = a1_ref.shape[1]

    # Conv1d + bias + ReLU as ONE fused MXU matmul over all BT*T time rows.
    C = jnp.dot(x_ref[...], wc_ref[...], preferred_element_type=jnp.float32)
    C = jnp.maximum(C + bc_ref[...], 0.0)                       # (BT*T, F)

    # Batched id-attention query: qw = relu(id @ Wl1 + b); g = qw @ A1.
    qw = jnp.dot(id_ref[...], wl1_ref[...],
                 preferred_element_type=jnp.float32) + bl1_ref[...]
    qw = jnp.maximum(qw, 0.0)                                   # (BT, A)
    g = jnp.dot(qw, a1_ref[...], preferred_element_type=jnp.float32)  # (BT, F)

    # Attention scores on the VPU/XLU: broadcast-multiply + lane reduction,
    # avoiding a transposed M=1 matmul per review.
    C3 = C.reshape(BT, T, Fn)                                   # (BT, T, F)
    scores = jnp.sum(g[:, None, :] * C3, axis=-1)               # (BT, T)

    # Softmax over the time axis.
    m = jnp.max(scores, axis=-1, keepdims=True)
    e = jnp.exp(scores - m)
    denom = jnp.sum(e, axis=-1, keepdims=True)
    # NOTE: pl.reciprocal(denom, approx=True) would push the divide onto the
    # otherwise-idle EUP slot; we keep the exact divide so the result stays
    # bit-comparable with the f32 reference (kernel is overhead-bound anyway).
    alph = e / denom                                            # (BT, T)

    # Weighted pooling: d[b, f] = sum_t alph[b, t] * C[b, t, f].
    d = jnp.sum(alph[:, :, None] * C3, axis=1)                  # (BT, F)
    o_ref[...] = d.astype(o_ref.dtype)


# ---- wrapper -----------------------------------------------------------------
def review_encoder_forward(params, sentence_vector, id_num):
    T, E, Fn, K = WORDS_SIZE, WORD_EMBEDDING_DIM, NUM_OF_FILTERS, WINDOW_SIZE_CNN
    ID, A = ID_EMBEDDING_DIM, ATTEN_VEC_DIM
    pad = (K - 1) // 2

    sent_ids = sentence_vector.reshape(-1)
    B = sent_ids.shape[0] // T

    # Glue in plain JAX: embedding gathers, zero padding, im2col layout.
    x = jnp.take(params["word_emb"], sent_ids, axis=0).reshape(B, T, E)
    x_pad = jnp.pad(x, ((0, 0), (pad, pad), (0, 0)))            # (B, T+K-1, E)
    # im2col: cols[b, t, k, e] = x_pad[b, t + k, e]
    cols = jnp.stack([x_pad[:, k:k + T, :] for k in range(K)], axis=2)
    x_cols = cols.reshape(B * T, K * E)                         # (B*T, K*E)

    id_vec = jnp.take(params["id_emb"], id_num.reshape(-1), axis=0)  # (B, ID)

    # Parameter re-layout for the kernel.
    # conv_w (F, E, K) -> (K, E, F) -> (K*E, F) so w[k*E+e, f] = conv_w[f, e, k]
    wc = jnp.transpose(params["conv_w"], (2, 1, 0)).reshape(K * E, Fn)
    bc = params["conv_b"].reshape(1, Fn)
    wl1_t = params["l1_w"].T                                    # (ID, A)
    bl1 = params["l1_b"].reshape(1, A)
    a1 = params["A1"]                                           # (A, F)

    # Whole batch in one grid step. For large B, set BT to a multiple of 8
    # (e.g. 8 or 16 reviews / step) and mark the axis "parallel".
    BT = B
    grid = (B // BT,)

    kernel = functools.partial(_review_encoder_kernel, BT=BT, T=T)
    out = pl.pallas_call(
        kernel,
        out_shape=jax.ShapeDtypeStruct((B, Fn), jnp.float32),
        grid_spec=pltpu.PrefetchScalarGridSpec(
            num_scalar_prefetch=0,
            grid=grid,
            in_specs=[
                pl.BlockSpec((BT * T, K * E), lambda i: (i, 0)),
                pl.BlockSpec((K * E, Fn), lambda i: (0, 0)),
                pl.BlockSpec((1, Fn), lambda i: (0, 0)),
                pl.BlockSpec((BT, ID), lambda i: (i, 0)),
                pl.BlockSpec((ID, A), lambda i: (0, 0)),
                pl.BlockSpec((1, A), lambda i: (0, 0)),
                pl.BlockSpec((A, Fn), lambda i: (0, 0)),
            ],
            out_specs=pl.BlockSpec((BT, Fn), lambda i: (i, 0)),
        ),
        compiler_params=pltpu.CompilerParams(
            dimension_semantics=("arbitrary",)),
    )(x_cols, wc, bc, id_vec, wl1_t, bl1, a1)

    return out.reshape(B, Fn, 1)   # matches PyTorch d: (B, NUM_OF_FILTERS, 1)


# ---- plain-JAX reference (same math, for correctness check) ------------------
def reference_forward(params, sentence_vector, id_num):
    T, E, Fn, K = WORDS_SIZE, WORD_EMBEDDING_DIM, NUM_OF_FILTERS, WINDOW_SIZE_CNN
    pad = (K - 1) // 2
    sent_ids = sentence_vector.reshape(-1)
    B = sent_ids.shape[0] // T

    x = jnp.take(params["word_emb"], sent_ids, axis=0).reshape(B, T, E)
    x_pad = jnp.pad(x, ((0, 0), (pad, pad), (0, 0)))
    C = jnp.zeros((B, T, Fn), jnp.float32)
    for k in range(K):
        C = C + jnp.einsum("bte,fe->btf", x_pad[:, k:k + T, :],
                           params["conv_w"][:, :, k])
    C = jax.nn.relu(C + params["conv_b"][None, None, :])

    idv = jnp.take(params["id_emb"], id_num.reshape(-1), axis=0)        # (B, ID)
    qw = jax.nn.relu(idv @ params["l1_w"].T + params["l1_b"][None, :])  # (B, A)
    g = qw @ params["A1"]                                               # (B, F)
    scores = jnp.einsum("bf,btf->bt", g, C)
    alph = jax.nn.softmax(scores, axis=1)
    d = jnp.einsum("bt,btf->bf", alph, C)
    return d.reshape(B, Fn, 1)


# ---- main --------------------------------------------------------------------
if __name__ == "__main__":
    key = jax.random.PRNGKey(0)
    ks = jax.random.split(key, 8)

    params = {
        "word_emb": jax.random.normal(ks[0], (VOCAB_SIZE, WORD_EMBEDDING_DIM),
                                      jnp.float32),
        "id_emb": jax.random.normal(ks[1], (NUM_IDS, ID_EMBEDDING_DIM),
                                    jnp.float32),
        "conv_w": 0.1 * jax.random.normal(
            ks[2], (NUM_OF_FILTERS, WORD_EMBEDDING_DIM, WINDOW_SIZE_CNN),
            jnp.float32),
        "conv_b": 0.1 * jax.random.normal(ks[3], (NUM_OF_FILTERS,), jnp.float32),
        "l1_w": 0.1 * jax.random.normal(
            ks[4], (ATTEN_VEC_DIM, ID_EMBEDDING_DIM), jnp.float32),
        "l1_b": 0.1 * jax.random.normal(ks[5], (ATTEN_VEC_DIM,), jnp.float32),
        "A1": jax.random.normal(ks[6], (ATTEN_VEC_DIM, NUM_OF_FILTERS),
                                jnp.float32),
    }

    sentence_vector = jax.random.randint(ks[7], (BATCH, WORDS_SIZE), 0,
                                         VOCAB_SIZE, dtype=jnp.int32)
    id_num = jnp.array([1, 7], dtype=jnp.int32)

    d_kernel = review_encoder_forward(params, sentence_vector, id_num)
    d_kernel = jax.block_until_ready(d_kernel)

    d_ref = reference_forward(params, sentence_vector, id_num)
    assert d_kernel.shape == (BATCH, NUM_OF_FILTERS, 1)
    assert jnp.allclose(d_kernel, d_ref, rtol=1e-4, atol=1e-4)

    print("KERNEL_OK")
</pallas_src>

<mosaic_0001>
module attributes {stable_mosaic.version = 11 : i64} {
  func.func @_review_encoder_kernel(%arg0: i32, %arg1: memref<32x96xf32, #tpu.memory_space<vmem>>, %arg2: memref<96x32xf32, #tpu.memory_space<vmem>>, %arg3: memref<1x32xf32, #tpu.memory_space<vmem>>, %arg4: memref<2x32xf32, #tpu.memory_space<vmem>>, %arg5: memref<32x32xf32, #tpu.memory_space<vmem>>, %arg6: memref<1x32xf32, #tpu.memory_space<vmem>>, %arg7: memref<32x32xf32, #tpu.memory_space<vmem>>, %arg8: memref<2x32xf32, #tpu.memory_space<vmem>>) attributes {dimension_semantics = [#tpu.dimension_semantics<arbitrary>], iteration_bounds = array<i64: 1>, scalar_prefetch = 0 : i64, scratch_operands = 0 : i64, tpu.core_type = #tpu.core_type<tc>, window_params = [{transform_indices = @transform_0, window_bounds = array<i64: 32, 96>}, {pipeline_mode = #tpu.pipeline_mode<synchronous>, transform_indices = @transform_1, window_bounds = array<i64: 96, 32>}, {pipeline_mode = #tpu.pipeline_mode<synchronous>, transform_indices = @transform_2, window_bounds = array<i64: 1, 32>}, {transform_indices = @transform_3, window_bounds = array<i64: 2, 32>}, {pipeline_mode = #tpu.pipeline_mode<synchronous>, transform_indices = @transform_4, window_bounds = array<i64: 32, 32>}, {pipeline_mode = #tpu.pipeline_mode<synchronous>, transform_indices = @transform_5, window_bounds = array<i64: 1, 32>}, {pipeline_mode = #tpu.pipeline_mode<synchronous>, transform_indices = @transform_6, window_bounds = array<i64: 32, 32>}, {transform_indices = @transform_7, window_bounds = array<i64: 2, 32>}]} {
    %c0 = arith.constant 0 : index
    %c0_0 = arith.constant 0 : index
    %0 = vector.load %arg1[%c0, %c0_0] : memref<32x96xf32, #tpu.memory_space<vmem>>, vector<32x96xf32>
    %c0_1 = arith.constant 0 : index
    %c0_2 = arith.constant 0 : index
    %1 = vector.load %arg2[%c0_1, %c0_2] : memref<96x32xf32, #tpu.memory_space<vmem>>, vector<96x32xf32>
    %cst = arith.constant dense<0.000000e+00> : vector<32x32xf32>
    %2 = tpu.matmul %0, %1, %cst {dimension_numbers = #tpu.dot_dimension_numbers<[1], [0], [0], [1], [0, 0, 1, 1], [], []>} : vector<32x96xf32>, vector<96x32xf32>, vector<32x32xf32> -> vector<32x32xf32>
    %c0_3 = arith.constant 0 : index
    %c0_4 = arith.constant 0 : index
    %3 = vector.load %arg3[%c0_3, %c0_4] : memref<1x32xf32, #tpu.memory_space<vmem>>, vector<1x32xf32>
    %4 = vector.broadcast %3 : vector<1x32xf32> to vector<32x32xf32>
    %5 = arith.addf %2, %4 : vector<32x32xf32>
    %cst_5 = arith.constant 0.000000e+00 : f32
    %6 = vector.broadcast %cst_5 : f32 to vector<32x32xf32>
    %7 = arith.maximumf %5, %6 : vector<32x32xf32>
    %c0_6 = arith.constant 0 : index
    %c0_7 = arith.constant 0 : index
    %8 = vector.load %arg4[%c0_6, %c0_7] : memref<2x32xf32, #tpu.memory_space<vmem>>, vector<2x32xf32>
    %c0_8 = arith.constant 0 : index
    %c0_9 = arith.constant 0 : index
    %9 = vector.load %arg5[%c0_8, %c0_9] : memref<32x32xf32, #tpu.memory_space<vmem>>, vector<32x32xf32>
    %cst_10 = arith.constant dense<0.000000e+00> : vector<2x32xf32>
    %10 = tpu.matmul %8, %9, %cst_10 {dimension_numbers = #tpu.dot_dimension_numbers<[1], [0], [0], [1], [0, 0, 1, 1], [], []>} : vector<2x32xf32>, vector<32x32xf32>, vector<2x32xf32> -> vector<2x32xf32>
    %c0_11 = arith.constant 0 : index
    %c0_12 = arith.constant 0 : index
    %11 = vector.load %arg6[%c0_11, %c0_12] : memref<1x32xf32, #tpu.memory_space<vmem>>, vector<1x32xf32>
    %12 = vector.broadcast %11 : vector<1x32xf32> to vector<2x32xf32>
    %13 = arith.addf %10, %12 : vector<2x32xf32>
    %cst_13 = arith.constant 0.000000e+00 : f32
    %14 = vector.broadcast %cst_13 : f32 to vector<2x32xf32>
    %15 = arith.maximumf %13, %14 : vector<2x32xf32>
    %c0_14 = arith.constant 0 : index
    %c0_15 = arith.constant 0 : index
    %16 = vector.load %arg7[%c0_14, %c0_15] : memref<32x32xf32, #tpu.memory_space<vmem>>, vector<32x32xf32>
    %cst_16 = arith.constant dense<0.000000e+00> : vector<2x32xf32>
    %17 = tpu.matmul %15, %16, %cst_16 {dimension_numbers = #tpu.dot_dimension_numbers<[1], [0], [0], [1], [0, 0, 1, 1], [], []>} : vector<2x32xf32>, vector<32x32xf32>, vector<2x32xf32> -> vector<2x32xf32>
    %18 = vector.shape_cast %7 : vector<32x32xf32> to vector<2x16x32xf32>
    %19 = vector.shape_cast %17 : vector<2x32xf32> to vector<2x1x32xf32>
    %20 = vector.broadcast %19 : vector<2x1x32xf32> to vector<2x16x32xf32>
    %21 = arith.mulf %20, %18 : vector<2x16x32xf32>
    %cst_17 = arith.constant dense<0.000000e+00> : vector<2x16xf32>
    %22 = vector.multi_reduction <add>, %21, %cst_17 [2] : vector<2x16x32xf32> to vector<2x16xf32>
    %cst_18 = arith.constant dense<0xFF800000> : vector<2xf32>
    %23 = vector.multi_reduction <maximumf>, %22, %cst_18 [1] : vector<2x16xf32> to vector<2xf32>
    %24 = vector.shape_cast %23 : vector<2xf32> to vector<2x1xf32>
    %25 = vector.broadcast %24 : vector<2x1xf32> to vector<2x16xf32>
    %26 = arith.subf %22, %25 : vector<2x16xf32>
    %27 = math.exp %26 : vector<2x16xf32>
    %cst_19 = arith.constant dense<0.000000e+00> : vector<2xf32>
    %28 = vector.multi_reduction <add>, %27, %cst_19 [1] : vector<2x16xf32> to vector<2xf32>
    %29 = vector.shape_cast %28 : vector<2xf32> to vector<2x1xf32>
    %30 = vector.broadcast %29 : vector<2x1xf32> to vector<2x16xf32>
    %31 = arith.divf %27, %30 : vector<2x16xf32>
    %32 = vector.shape_cast %31 : vector<2x16xf32> to vector<2x16x1xf32>
    %33 = vector.broadcast %32 : vector<2x16x1xf32> to vector<2x16x32xf32>
    %34 = arith.mulf %33, %18 : vector<2x16x32xf32>
    %cst_20 = arith.constant dense<0.000000e+00> : vector<2x32xf32>
    %35 = vector.multi_reduction <add>, %34, %cst_20 [1] : vector<2x16x32xf32> to vector<2x32xf32>
    %c0_21 = arith.constant 0 : index
    %c0_22 = arith.constant 0 : index
    %36 = vector.load %arg8[%c0_21, %c0_22] : memref<2x32xf32, #tpu.memory_space<vmem>>, vector<2x32xf32>
    tpu.vector_store %arg8[%c0_21, %c0_22], %35 {strides = array<i32>} : memref<2x32xf32, #tpu.memory_space<vmem>>, vector<2x32xf32>,
    return
  }
  func.func @transform_0(%arg0: i32) -> (i32, i32) {
    %c0_i32 = arith.constant 0 : i32
    %c0_i32_0 = arith.constant 0 : i32
    return %arg0, %c0_i32 : i32, i32
  }
  func.func @transform_1(%arg0: i32) -> (i32, i32) {
    %c0_i32 = arith.constant 0 : i32
    %c0_i32_0 = arith.constant 0 : i32
    %c0_i32_1 = arith.constant 0 : i32
    return %c0_i32, %c0_i32_0 : i32, i32
  }
  func.func @transform_2(%arg0: i32) -> (i32, i32) {
    %c0_i32 = arith.constant 0 : i32
    %c0_i32_0 = arith.constant 0 : i32
    %c0_i32_1 = arith.constant 0 : i32
    return %c0_i32, %c0_i32_0 : i32, i32
  }
  func.func @transform_3(%arg0: i32) -> (i32, i32) {
    %c0_i32 = arith.constant 0 : i32
    %c0_i32_0 = arith.constant 0 : i32
    return %arg0, %c0_i32 : i32, i32
  }
  func.func @transform_4(%arg0: i32) -> (i32, i32) {
    %c0_i32 = arith.constant 0 : i32
    %c0_i32_0 = arith.constant 0 : i32
    %c0_i32_1 = arith.constant 0 : i32
    return %c0_i32, %c0_i32_0 : i32, i32
  }
  func.func @transform_5(%arg0: i32) -> (i32, i32) {
    %c0_i32 = arith.constant 0 : i32
    %c0_i32_0 = arith.constant 0 : i32
    %c0_i32_1 = arith.constant 0 : i32
    return %c0_i32, %c0_i32_0 : i32, i32
  }
  func.func @transform_6(%arg0: i32) -> (i32, i32) {
    %c0_i32 = arith.constant 0 : i32
    %c0_i32_0 = arith.constant 0 : i32
    %c0_i32_1 = arith.constant 0 : i32
    return %c0_i32, %c0_i32_0 : i32, i32
  }
  func.func @transform_7(%arg0: i32) -> (i32, i32) {
    %c0_i32 = arith.constant 0 : i32
    %c0_i32_0 = arith.constant 0 : i32
    return %arg0, %c0_i32 : i32, i32
  }
}

</mosaic_0001>

<bundles_post_ra>
// kernel: tpu_custom_call.1
= control target key start
LH: loop header
LB: loop body
LE: loop exit
PB: predicated region body
PF: predicated region fallthrough
CT: control target
= control target key end

     0   :  { %v666_v1 = vmov 0.0   ;;  %vm667_vm0 = vmmov 0   ;;  %vm164_vm1 = vcmask 261120   ;;  %s871_s0 = inlined_call_operand.vmem [shape: f32[32,96], index: 0, kind: input, shape index: {}]   ;;  %s872_s1 = inlined_call_operand.vmem [shape: f32[96,32], index: 1, kind: input, shape index: {}]   ;;  %s873_s2 = inlined_call_operand.vmem [shape: f32[1,32], index: 2, kind: input, shape index: {}]   ;;  %s874_s3 = inlined_call_operand.vmem [shape: f32[2,32], index: 3, kind: input, shape index: {}]   ;;  %s875_s4 = inlined_call_operand.vmem [shape: f32[32,32], index: 4, kind: input, shape index: {}]   ;;  %s876_s5 = inlined_call_operand.vmem [shape: f32[1,32], index: 5, kind: input, shape index: {}]   ;;  %s877_s6 = inlined_call_operand.vmem [shape: f32[32,32], index: 6, kind: input, shape index: {}]   ;;  %s878_s7 = inlined_call_operand.hbm [shape: f32[2,32], index: 7, kind: output, shape index: {}]  }
   0x1   :  { %v156_v0 = vld [vmem:[%s875_s4 + $0x18] sm:$0xff]  ;;  %603 = vmatprep.subr.mxu1 %v666_v1  ;;  %v155_v2 = vld [vmem:[%s875_s4 + $0x10] sm:$0xff]  ;;  %611 = vmatprep.mubr.msk.f32.mxu1 %vm667_vm0, %v666_v1  ;;  %v154_v5 = vld [vmem:[%s875_s4 + $0x8] sm:$0xff] }
   0x2   :  { %v42_v3 = vld [vmem:[%s872_s1 + $0x58] sm:$0xff]  ;;  %604 = vmatpush3.msra.mxu1 %v156_v0  ;;  %v41_v4 = vld [vmem:[%s872_s1 + $0x50] sm:$0xff]  ;;  %v40_v6 = vld [vmem:[%s872_s1 + $0x48] sm:$0xff] }
   0x3   :  { %573 = vmatprep.subr.mxu0 %v42_v3  ;;  %605 = vmatprep.subr.mxu1 %v666_v1  ;;  %v153_v7 = vld [vmem:[%s875_s4] sm:$0xff] }
   0x4   :  { %574 = vmatpush3.msra.mxu0 %v42_v3  ;;  %606 = vmatpush3.msra.mxu1 %v155_v2  ;;  %v39_v8 = vld [vmem:[%s872_s1 + $0x40] sm:$0xff] }
   0x5   :  { %575 = vmatprep.subr.mxu0 %v41_v4  ;;  %607 = vmatprep.subr.mxu1 %v666_v1  ;;  %v152_v9 = vld [vmem:[%s874_s3] sm:$0x3] }
   0x6   :  { %576 = vmatpush3.msra.mxu0 %v41_v4  ;;  %608 = vmatpush3.msra.mxu1 %v154_v5 }
   0x7   :  { %577 = vmatprep.subr.mxu0 %v40_v6 }
   0x8   :  { %12 = vsyncpa [#allocation3], 0  ;;  %609 = vmatprep.subr.mxu1 %v666_v1  ;;  %578 = vmatpush3.msra.mxu0 %v40_v6  ;;  %v38_v10 = vld [vmem:[%s872_s1 + $0x38] sm:$0xff]  ;;  %v37_v12 = vld [vmem:[%s872_s1 + $0x30] sm:$0xff]  ;;  %vm50_vm2 = vcmask 785408   ;;  %v320_v34 = vlaneseq  ;;  %vm380_vm3 = vcmask 130112  }
   0x9   :  { %610 = vmatpush3.msra.mxu1 %v153_v7  ;;  %579 = vmatprep.subr.mxu0 %v39_v8  ;;  %v242_v11 = vld [vmem:[%s877_s6 + $0x18] sm:$0xff]  ;;  %v27_v13 = vld [vmem:[%s871_s0] sm:$0xff]  ;;  %v36_v14 = vld [vmem:[%s872_s1 + $0x28] sm:$0xff]  ;;  %v668_v32 = vmov 1966171168   ;;  %vm391_vm4 = vcmask 1041409  }
   0xa   :  { %612 = vmatmul.mubr.msk.f32.vlgmr.msra.gmra.mxu1 %vm164_vm1, %v152_v9  ;;  %580 = vmatpush3.msra.mxu0 %v39_v8  ;;  %v35_v15 = vld [vmem:[%s872_s1 + $0x20] sm:$0xff]  ;;  %v34_v16 = vld [vmem:[%s872_s1 + $0x18] sm:$0xff]  ;;  %v33_v17 = vld [vmem:[%s872_s1 + $0x10] sm:$0xff]  ;;  %v318_v33 = vunpack.c.l.s4 %v668_v32  ;;  %v807_v37 = vshrl.u32 %v320_v34, 7  ;;  %v370_v3 = vand.u32 127, %v320_v34  ;;  %vm394_vm5 = vcmask 123904  }
   0xb   :  { %581 = vmatprep.subr.mxu0 %v38_v10  ;;  %614 = vmatprep.subr.mxu1 %v666_v1  ;;  %v32_v18 = vld [vmem:[%s872_s1 + $0x8] sm:$0xff]  ;;  %v31_v19 = vld [vmem:[%s872_s1] sm:$0xff]  ;;  %v241_v20 = vld [vmem:[%s877_s6 + $0x10] sm:$0xff]  ;;  %vm523_vm6 = vcmask 254976  }
   0xc   :  { %582 = vmatpush3.msra.mxu0 %v38_v10  ;;  %615 = vmatpush3.msra.mxu1 %v242_v11  ;;  %v28_v21 = vld [vmem:[%s871_s0 + $0x8] sm:$0xff]  ;;  %v29_v23 = vld [vmem:[%s871_s0 + $0x10] sm:$0xff]  ;;  %v239_v24 = vld [vmem:[%s877_s6] sm:$0xff]  ;;  %v319_v36 = vunpack.c.0.s8 %v318_v33  ;;  %v816_v45 = vsub.s32 0, %v807_v37  ;;  %v375_v4 = vadd.s32 4294967288, %v370_v3  ;;  %v373_v8 = vsub.s32 %v370_v3, %v807_v37 }
   0xd   :  { %583 = vmatprep.subr.mxu0 %v37_v12  ;;  %616 = vmatprep.subr.mxu1 %v666_v1  ;;  %v240_v22 = vld [vmem:[%s877_s6 + $0x8] sm:$0xff]  ;;  %v30_v25 = vld [vmem:[%s871_s0 + $0x18] sm:$0xff]  ;;  %v544_v26 = vld [vmem:[%s876_s5] ss:$0 sm:$0xff] }
   0xe   :  { %584 = vmatpush3.msra.mxu0 %v37_v12  ;;  %597 = vmatprep.mubr.msk.f32.mxu0 %vm50_vm2, %v27_v13  ;;  %v322_v39 = vsub.s32 %v319_v36, %v807_v37  ;;  %v539_v40 = vld [vmem:[%s873_s2] ss:$0 sm:$0xff]  ;;  %v378_v6 = vsub.s32 %v375_v4, %v807_v37  ;;  %s670_s2 = smov [#allocation2]  }
   0xf   :  { %585 = vmatprep.subr.mxu0 %v36_v14  ;;  %622 = vmatprep.mubr.msk.f32.mxu1 %vm667_vm0, %v666_v1  ;;  %s531_s5 = sshll.u32 %s670_s2, 4  ;;  %s532_s5 = int_to_ptr.vmem [resolvable:$true] %s531_s5 }
  0x10   :  { %586 = vmatpush3.msra.mxu0 %v36_v14  ;;  %617 = vmatpush3.msra.mxu1 %v241_v20  ;;  %v405_v20 = vsub.s32 1, %v807_v37  ;;  %s644_s25 = scalar_lea.vmem %s532_s5, 32  ;;  %p649_p1 = scmp.lt.s32.totalorder %s532_s5, %s532_s5 }
  0x11   :  { %587 = vmatprep.subr.mxu0 %v35_v15  ;;  %618 = vmatprep.subr.mxu1 %v666_v1  ;;  %p645_p0 = scmp.ne.s32.totalorder %s532_s5, %s644_s25  ;;  %p650_p2 = scmp.lt.s32.totalorder %s644_s25, %s644_s25 }
  0x12   :  { %588 = vmatpush3.msra.mxu0 %v35_v15  ;;  %619 = vmatpush3.msra.mxu1 %v240_v22 }
  0x13   :  { %589 = vmatprep.subr.mxu0 %v34_v16  ;;  %620 = vmatprep.subr.mxu1 %v666_v1  ;;  %p651_p3 = por %p650_p2, %p649_p1 }
  0x14   :  { %590 = vmatpush3.msra.mxu0 %v34_v16  ;;  %621 = vmatpush3.msra.mxu1 %v239_v24 }
  0x15   :  { %591 = vmatprep.subr.mxu0 %v33_v17  ;;  %p652_p4 = pnand %p651_p3, %p645_p0 }
  0x16   :  { %592 = vmatpush3.msra.mxu0 %v33_v17 }
  0x17   :  { %593 = vmatprep.subr.mxu0 %v32_v18 }
  0x18   :  { %594 = vmatpush3.msra.mxu0 %v32_v18 }
  0x19   :  { %595 = vmatprep.subr.mxu0 %v31_v19 }
  0x1a   :  { %596 = vmatpush3.msra.mxu0 %v31_v19  ;;  %v669_v19 = vmov 0  }
  0x1b   :  { %598 = vmatmul.mubr.msk.f32.vlgmr.msra.gmra.mxu0 %vm50_vm2, %v28_v21  ;;  %631 = vset.pattern.permute.xlu0 %v669_v19 }
  0x1c   :  { %600 = vmatprep.mubr.msk.f32.mxu0 %vm50_vm2, %v29_v23  ;;  %630 = vset.pattern.permute.xlu1 %v669_v19 }
  0x1f   :  { %601 = vmatmul.mubr.msk.f32.gmra.mxu0 %vm50_vm2, %v30_v25 }
  0xca   :  { %v234_v27 = vpop.f32.mrf.mxu1 }
  0xcb   :  { %v235_v28 = vadd.f32 %v544_v26, %v234_v27 }
  0xcc   :  { %v613_v29 = vpop.f32.mrf.mxu1 }
  0xcd   :  { %v238_v30 = vmax.f32 %v235_v28, 0.0 }
  0xcf   :  { %623 = vmatmul.mubr.msk.f32.vlgmr.msra.gmra.mxu1 %vm164_vm1, %v238_v30 }
  0xdb   :  { %v599_v31 = vpop.f32.mrf.mxu0 }
  0xdc   :  { %v818_v47 = vadd.f32 %v599_v31, %v539_v40 }
  0xdd   :  { %v129_v35 = vpop.f32.mrf.mxu0 }
  0xde   :  { %v813_v43 = vadd.f32 %v539_v40, %v129_v35  ;;  %v149_v55 = vmax.f32 %v818_v47, 0.0 }
  0xdf   :  { %v602_v38 = vpop.f32.mrf.mxu0 }
  0xe0   :  { %v148_v51 = vmax.f32 %v813_v43, 0.0  ;;  %v823_v52 = vadd.f32 %v602_v38, %v539_v40 }
  0xe1   :  { %v139_v42 = vpop.f32.mrf.mxu0 }
  0xe2   :  { %v820_v50 = vadd.f32 %v539_v40, %v139_v42  ;;  %v151_v59 = vmax.f32 %v823_v52, 0.0 }
  0xe4   :  { %v150_v56 = vmax.f32 %v820_v50, 0.0 }
 0x18f   :  { %v312_v41 = vpop.f32.mrf.mxu1 }
 0x190   :  { %v323_v44 = vrot.slane %v312_v41, %v322_v39 }
 0x191   :  { %v624_v46 = vpop.f32.mrf.mxu1 }
 0x192   :  { %v324_v48 = vcombine.high %v323_v44, %v323_v44  ;;  %v331_v49 = vrot.slane %v323_v44, %v322_v39 }
 0x194   :  { %v338_v53 = vrot.slane %v324_v48, %v322_v39  ;;  %v342_v54 = vrot.slane %v331_v49, %v816_v45 }
 0x196   :  { %v349_v57 = vmul.f32 %v342_v54, %v148_v51  ;;  %v346_v58 = vrot.slane %v338_v53, %v816_v45  ;;  %v350_v62 = vmul.f32 %v342_v54, %v149_v55 }
 0x198   :  { %v353_v60 = vsel %vm164_vm1, %v349_v57, 0.0  ;;  %v351_v61 = vmul.f32 %v346_v58, %v150_v56  ;;  %v352_v0 = vmul.f32 %v346_v58, %v151_v59  ;;  %v356_v1 = vsel %vm164_vm1, %v350_v62, 0.0 }
 0x199   :  { %354 = vadd.xlane.f32.xlu0 %v353_v60 }
 0x19a   :  { %v359_v63 = vsel %vm164_vm1, %v351_v61, 0.0  ;;  %v362_v2 = vsel %vm164_vm1, %v352_v0, 0.0 }
 0x19b   :  { %360 = vadd.xlane.f32.xlu1 %v359_v63 }
 0x19d   :  { %357 = vadd.xlane.f32.xlu0 %v356_v1 }
 0x19f   :  { %363 = vadd.xlane.f32.xlu1 %v362_v2 }
 0x222   :  { %v355_v5 = vpop.xlane.xlu0 %354 }
 0x223   :  { %v374_v12 = vrot.slane %v355_v5, %v373_v8 }
 0x224   :  { %v361_v7 = vpop.xlane.xlu1 %360 }
 0x225   :  { %v385_v13 = vrot.slane %v361_v7, %v373_v8 }
 0x226   :  { %v358_v9 = vpop.xlane.xlu0 %357 }
 0x227   :  { %v379_v10 = vrot.slane %v358_v9, %v378_v6 }
 0x228   :  { %v364_v11 = vpop.xlane.xlu1 %363 }
 0x229   :  { %v389_v14 = vrot.slane %v364_v11, %v378_v6  ;;  %v381_v15 = vsel %vm380_vm3, %v379_v10, %v374_v12 }
 0x22b   :  { %v390_v16 = vsel %vm380_vm3, %v389_v14, %v385_v13 }
 0x22c   :  { %v392_v17 = vsel %vm391_vm4, %v390_v16, %v381_v15 }
 0x22d   :  { %v395_v18 = vsel %vm394_vm5, %v392_v17, -inf }
 0x22e   :  { %396 = vmax.xlane.f32.xlu0 %v395_v18 }
 0x2b7   :  { %v397_v21 = vpop.xlane.xlu0 %396 }
 0x2b8   :  { %v402_v22 = vrot.slane %v397_v21, %v816_v45  ;;  %v406_v23 = vrot.slane %v397_v21, %v405_v20 }
 0x2ba   :  { %v409_v24 = vsub.f32 %v355_v5, %v402_v22  ;;  %v410_v25 = vsub.f32 %v358_v9, %v402_v22  ;;  %v411_v26 = vsub.f32 %v361_v7, %v406_v23  ;;  %v412_v29 = vsub.f32 %v364_v11, %v406_v23 }
 0x2bc   :  { %v413_v27 = vmul.f32 1.442695, %v409_v24  ;;  %v415_v28 = vmul.f32 1.442695, %v410_v25  ;;  %v417_v30 = vmul.f32 1.442695, %v411_v26 }
 0x2bd   :  { %v419_v31 = vmul.f32 1.442695, %v412_v29 }
 0x2be   :  { %632 = vpow2.f32 %v413_v27 }
 0x2bf   :  { %634 = vpow2.f32 %v415_v28 }
 0x2c0   :  { %636 = vpow2.f32 %v417_v30 }
 0x2c1   :  { %638 = vpow2.f32 %v419_v31 }
 0x2cb   :  { %v633_v32 = vpop.eup %632 }
 0x2cc   :  { %v635_v33 = vpop.eup %634  ;;  %426 = vperm.xlu1 %630, %v633_v32  }
 0x2cd   :  { %429 = vperm.xlu0 %631, %v635_v33   ;;  %v637_v34 = vpop.eup %636 }
 0x2ce   :  { %v639_v35 = vpop.eup %638 }
 0x2d0   :  { %432 = vperm.xlu1 %630, %v637_v34  }
 0x2d4   :  { %435 = vperm.xlu1 %630, %v639_v35  }
 0x347   :  { %v427_v36 = vpop.permute.xlu1 %426 }
 0x348   :  { %v430_v37 = vpop.permute.xlu0 %429  ;;  %v440_v40 = vrot.slane %v427_v36, %v373_v8 }
 0x349   :  { %v444_v39 = vrot.slane %v430_v37, %v378_v6 }
 0x34b   :  { %v433_v38 = vpop.permute.xlu1 %432  ;;  %v445_v46 = vsel %vm380_vm3, %v444_v39, %v440_v40 }
 0x34c   :  { %v449_v42 = vrot.slane %v433_v38, %v373_v8 }
 0x34f   :  { %v436_v41 = vpop.permute.xlu1 %435 }
 0x350   :  { %v453_v44 = vrot.slane %v436_v41, %v378_v6 }
 0x352   :  { %v454_v48 = vsel %vm380_vm3, %v453_v44, %v449_v42 }
 0x353   :  { %v455_v49 = vsel %vm391_vm4, %v454_v48, %v445_v46 }
 0x354   :  { %v457_v53 = vsel %vm394_vm5, %v455_v49, 0.0 }
 0x355   :  { %458 = vadd.xlane.f32.xlu1 %v457_v53 }
 0x3de   :  { %v459_v54 = vpop.xlane.xlu1 %458 }
 0x3df   :  { %v464_v57 = vrot.slane %v459_v54, %v816_v45  ;;  %v468_v58 = vrot.slane %v459_v54, %v405_v20 }
 0x3e1   :  { %640 = vrcp.f32 %v464_v57 }
 0x3e2   :  { %642 = vrcp.f32 %v468_v58 }
 0x3ee   :  { %v641_v60 = vpop.eup %640 }
 0x3ef   :  { %v472_v61 = vmul.f32 %v641_v60, %v633_v32  ;;  %v473_v62 = vmul.f32 %v641_v60, %v635_v33  ;;  %v643_v63 = vpop.eup %642 }
 0x3f0   :  { %v475_v0 = vmul.f32 %v643_v63, %v637_v34  ;;  %v476_v1 = vmul.f32 %v643_v63, %v639_v35 }
 0x3f1   :  { %479 = vperm.xlu0 %631, %v472_v61  }
 0x3f5   :  { %484 = vperm.xlu0 %631, %v473_v62  }
 0x3f9   :  { %489 = vperm.xlu0 %631, %v475_v0  }
 0x3fd   :  { %494 = vperm.xlu0 %631, %v476_v1  }
 0x46c   :  { %v480_v2 = vpop.permute.xlu0 %479 }
 0x46d   :  { %v497_v3 = vmul.f32 %v480_v2, %v148_v51 }
 0x46f   :  { %v501_v5 = vsel %vm164_vm1, %v497_v3, 0.0 }
 0x470   :  { %v485_v4 = vpop.permute.xlu0 %484 }
 0x471   :  { %v498_v45 = vmul.f32 %v485_v4, %v149_v55 }
 0x473   :  { %v502_v6 = vsel %vm164_vm1, %v498_v45, 0.0 }
 0x474   :  { %v503_v7 = vadd.f32 %v502_v6, %v501_v5  ;;  %v490_v8 = vpop.permute.xlu0 %489 }
 0x475   :  { %v499_v10 = vmul.f32 %v490_v8, %v150_v56 }
 0x476   :  { %v504_v9 = vrot.slane %v503_v7, 4 }
 0x477   :  { %v510_v51 = vsel %vm164_vm1, %v499_v10, 0.0 }
 0x478   :  { %v505_v11 = vadd.f32 %v504_v9, %v503_v7  ;;  %v495_v12 = vpop.permute.xlu0 %494 }
 0x479   :  { %v500_v43 = vmul.f32 %v495_v12, %v151_v59 }
 0x47a   :  { %v506_v55 = vrot.slane %v505_v11, 2 }
 0x47b   :  { %v511_v47 = vsel %vm164_vm1, %v500_v43, 0.0 }
 0x47c   :  { %v512_v13 = vadd.f32 %v511_v47, %v510_v51  ;;  %v507_v15 = vadd.f32 %v506_v55, %v505_v11 }
 0x47e   :  { %v513_v14 = vrot.slane %v512_v13, 4  ;;  %v508_v19 = vrot.slane %v507_v15, 1 }
 0x480   :  { %v514_v16 = vadd.f32 %v513_v14, %v512_v13  ;;  %v509_v50 = vadd.f32 %v508_v19, %v507_v15 }
 0x482   :  { %v515_v17 = vrot.slane %v514_v16, 2 }
 0x484   :  { %v516_v18 = vadd.f32 %v515_v17, %v514_v16 }
 0x486   :  { %v517_v20 = vrot.slane %v516_v18, 1 }
 0x488   :  { %v518_v56 = vadd.f32 %v517_v20, %v516_v18 }
 0x48a   :  { %v521_v52 = vsel %vm391_vm4, %v518_v56, %v509_v50 }
 0x48b   :  { %524 = vst.msk [vmem:[#allocation2] sm:$0x3] %vm523_vm6, %v521_v52 }
 0x48c   :  { %655 = shalt.err (!%p652_p4)
}
 0x48d   :  { %534 = dma.vmem_to_hbm [thread:$0]  %s532_s5, 32, %s878_s7, [#allocation3]  }
 0x48e   :  { %664 = dma.done.wait [#allocation3], 32  }
 0x48f   :  { %665 = vsyncadd [#allocation3], 4294967264 }
 0x490   :  { %538 = vsyncpa [#allocation3], 1 }

</bundles_post_ra>
